<compile_context>
chip_gen: v6e
topology: v6e:2x2x1
jax: 0.10.0
libtpu: 0.0.40
codegen_flags: <defaults>
</compile_context>

<pallas_src>
import functools
import math

import jax
import jax.numpy as jnp
from jax.experimental import pallas as pl
from jax.experimental.pallas import tpu as pltpu

_LANE = 128        # vreg lane width
_ROW_TILE = 1024   # rows per grid step: 1024*128*4B = 512 KiB per f32 buffer


# ---------------------------------------------------------------------------
# Glue: view arbitrary-shape input as a lane-dense 2D slab (rows, 128).
# Only pads the trailing (<128) elements when numel is not a multiple of 128.
# ---------------------------------------------------------------------------
def _to_2d(x):
    total = x.size
    flat = jnp.ravel(x)
    rem = total % _LANE
    if rem:
        flat = jnp.concatenate(
            [flat, jnp.zeros((_LANE - rem,), dtype=flat.dtype)])
    rows = flat.size // _LANE
    return flat.reshape(rows, _LANE), total


def _row_tiling(rows):
    """Pick a block row count and grid. Block rows must be a multiple of 8 or
    equal to the full row extent."""
    if rows <= _ROW_TILE:
        return rows, (1,)
    return _ROW_TILE, (pl.cdiv(rows, _ROW_TILE),)


# ---------------------------------------------------------------------------
# Kernel 1: global max(|x|)  (compute_integral_part, overflow_rate == 0)
# Gridded accumulator reduction: VPU max per tile, one XLU reduce at the end.
# ---------------------------------------------------------------------------
def _maxabs_kernel(x_ref, o_ref, acc_ref, *, total_rows, blk_rows):
    i = pl.program_id(0)

    @pl.when(i == 0)
    def _():
        acc_ref[...] = jnp.zeros_like(acc_ref)

    a = jnp.abs(x_ref[...].astype(jnp.float32))
    if total_rows % blk_rows != 0:
        # Last tile reads past the array; mask the garbage rows.
        row_idx = i * blk_rows + jax.lax.broadcasted_iota(jnp.int32, a.shape, 0)
        a = jnp.where(row_idx < total_rows, a, 0.0)
    acc_ref[...] = jnp.maximum(acc_ref[...], a)

    @pl.when(i == pl.num_programs(0) - 1)
    def _():
        o_ref[0, 0] = jnp.max(acc_ref[...])


def max_abs_pallas(x):
    x2, _ = _to_2d(x)
    rows = x2.shape[0]
    blk_rows, grid = _row_tiling(rows)
    kernel = functools.partial(
        _maxabs_kernel, total_rows=rows, blk_rows=blk_rows)
    out = pl.pallas_call(
        kernel,
        out_shape=jax.ShapeDtypeStruct((1, 1), jnp.float32),
        grid=grid,
        in_specs=[pl.BlockSpec((blk_rows, _LANE), lambda i: (i, 0))],
        out_specs=pl.BlockSpec(memory_space=pltpu.MemorySpace.SMEM),
        scratch_shapes=[pltpu.VMEM((blk_rows, _LANE), jnp.float32)],
        compiler_params=pltpu.CompilerParams(
            dimension_semantics=("arbitrary",)),
    )(x2)
    return out[0, 0]


# ---------------------------------------------------------------------------
# Kernel 2: linear_quantize elementwise
# ---------------------------------------------------------------------------
def _quant_kernel(params_ref, x_ref, o_ref):
    inv_delta = params_ref[0]
    delta = params_ref[1]
    min_val = params_ref[2]
    max_val = params_ref[3]
    x = x_ref[...].astype(jnp.float32)
    rounded = jnp.floor(x * inv_delta + 0.5)
    o_ref[...] = (jnp.clip(rounded, min_val, max_val) * delta).astype(o_ref.dtype)


def _sign_kernel(x_ref, o_ref):
    # bits == 1 path: sign(x) - 1
    x = x_ref[...].astype(jnp.float32)
    o_ref[...] = (jnp.sign(x) - 1.0).astype(o_ref.dtype)


def linear_quantize_pallas(x, sf, bits):
    assert bits >= 1, bits
    orig_shape = x.shape
    x2, total = _to_2d(x)
    rows = x2.shape[0]
    blk_rows, grid = _row_tiling(rows)
    blk = pl.BlockSpec((blk_rows, _LANE), lambda i: (i, 0))
    cparams = pltpu.CompilerParams(dimension_semantics=("parallel",))

    if bits == 1:
        out2 = pl.pallas_call(
            _sign_kernel,
            out_shape=jax.ShapeDtypeStruct(x2.shape, x2.dtype),
            grid=grid,
            in_specs=[blk],
            out_specs=blk,
            compiler_params=cparams,
        )(x2)
    else:
        delta = math.pow(2.0, -sf)
        bound = math.pow(2.0, bits - 1)
        params = jnp.array(
            [1.0 / delta, delta, -bound, bound - 1.0], dtype=jnp.float32)
        out2 = pl.pallas_call(
            _quant_kernel,
            out_shape=jax.ShapeDtypeStruct(x2.shape, x2.dtype),
            grid=grid,
            in_specs=[
                pl.BlockSpec(memory_space=pltpu.MemorySpace.SMEM),  # scalars
                blk,
            ],
            out_specs=blk,
            compiler_params=cparams,
        )(params, x2)

    out_flat = out2.reshape(-1)
    if out_flat.size != total:
        out_flat = out_flat[:total]
    return out_flat.reshape(orig_shape)


# ---------------------------------------------------------------------------
# Module-equivalent wrapper (stateful calibration counter, like nn.Module)
# ---------------------------------------------------------------------------
def compute_integral_part_pallas(x, overflow_rate):
    n = x.size
    split_idx = int(overflow_rate * n)
    if split_idx == 0:
        # overflow_rate == 0 (module default): quantile == max(|x|), in Pallas.
        v = float(jax.device_get(max_abs_pallas(x)))
    else:
        # TODO(synk): general quantile needs a full sort; no clean Pallas TPU
        # sort, fall back to plain-JAX sort for this non-default path.
        sorted_abs = jnp.sort(jnp.abs(jnp.ravel(x)))[::-1]
        v = float(sorted_abs[split_idx])
    return int(math.ceil(math.log2(v + 1e-12)))


class LinearQuantPallas:
    def __init__(self, name, bits, sf=None, overflow_rate=0.0, counter=10):
        self.name = name
        self._counter = counter
        self.bits = bits
        self.sf = sf
        self.overflow_rate = overflow_rate

    @property
    def counter(self):
        return self._counter

    def __call__(self, x):
        if self._counter > 0:
            self._counter -= 1
            sf_new = self.bits - 1 - compute_integral_part_pallas(
                x, self.overflow_rate)
            self.sf = min(self.sf, sf_new) if self.sf is not None else sf_new
            return x
        elif self._counter == -10:
            return x
        else:
            return linear_quantize_pallas(x, self.sf, self.bits)

    def __repr__(self):
        return "{}(sf={}, bits={}, overflow_rate={:.3f}, counter={})".format(
            self.__class__.__name__, self.sf, self.bits,
            self.overflow_rate, self.counter)


# ---------------------------------------------------------------------------
# Demo / self-test
# ---------------------------------------------------------------------------
if __name__ == "__main__":
    key = jax.random.PRNGKey(0)
    # NCHW input, small shape consistent with the module.
    x = jax.random.normal(key, (2, 4, 16, 16), dtype=jnp.float32) * 3.0

    q = LinearQuantPallas(name="act_quant", bits=8, overflow_rate=0.0, counter=1)

    # Call 1: calibration pass (counter > 0) -> returns input unchanged, sets sf.
    y_cal = q(x)
    jax.block_until_ready(y_cal)
    assert q.sf is not None
    assert jnp.allclose(y_cal, x)

    # Call 2: quantization pass (counter == 0) -> Pallas elementwise quantize.
    y_q = q(x)
    jax.block_until_ready(y_q)

    # Pure-JAX reference of linear_quantize.
    delta = 2.0 ** (-q.sf)
    bound = 2.0 ** (q.bits - 1)
    ref = jnp.clip(jnp.floor(x / delta + 0.5), -bound, bound - 1.0) * delta
    assert jnp.allclose(y_q, ref, atol=1e-6), "quantize mismatch vs reference"

    # bits == 1 path.
    y1 = linear_quantize_pallas(x, 0, 1)
    assert jnp.allclose(y1, jnp.sign(x) - 1.0)

    # Gridded / ragged max-abs path (rows > ROW_TILE, non-divisible tail).
    xb = jax.random.normal(jax.random.PRNGKey(1), (1100, 128), jnp.float32)
    mb = max_abs_pallas(xb)
    assert jnp.allclose(mb, jnp.max(jnp.abs(xb)), rtol=1e-6)

    # Element count not a multiple of 128 (lane-pad path) for quantize.
    xc = jax.random.normal(jax.random.PRNGKey(2), (3, 5, 7), jnp.float32)
    yc = linear_quantize_pallas(xc, 3, 8)
    refc = jnp.clip(jnp.floor(xc / 0.125 + 0.5), -128.0, 127.0) * 0.125
    assert jnp.allclose(yc, refc, atol=1e-6)

    jax.block_until_ready((y_q, y1, mb, yc))
    print("KERNEL_OK")
</pallas_src>

<mosaic_0001>
module attributes {stable_mosaic.version = 11 : i64} {
  func.func @_maxabs_kernel(%arg0: i32, %arg1: memref<16x128xf32, #tpu.memory_space<vmem>>, %arg2: memref<1x1xf32, #tpu.memory_space<smem>>, %arg3: memref<16x128xf32, #tpu.memory_space<vmem>>) attributes {dimension_semantics = [#tpu.dimension_semantics<arbitrary>], iteration_bounds = array<i64: 1>, scalar_prefetch = 0 : i64, scratch_operands = 1 : i64, tpu.core_type = #tpu.core_type<tc>, window_params = [{transform_indices = @transform_0, window_bounds = array<i64: 16, 128>}, {transform_indices = @transform_1, window_bounds = array<i64: 1, 1>}]} {
    %c0_i32 = arith.constant 0 : i32
    %0 = arith.cmpi eq, %arg0, %c0_i32 : i32
    %1 = arith.extui %0 : i1 to i32
    %c0_i32_0 = arith.constant 0 : i32
    %2 = arith.cmpi ne, %1, %c0_i32_0 : i32
    scf.if %2 {
      %cst = arith.constant 0.000000e+00 : f32
      %11 = vector.broadcast %cst : f32 to vector<16x128xf32>
      %c0_8 = arith.constant 0 : index
      %c0_9 = arith.constant 0 : index
      %12 = vector.load %arg3[%c0_8, %c0_9] : memref<16x128xf32, #tpu.memory_space<vmem>>, vector<16x128xf32>
      tpu.vector_store %arg3[%c0_8, %c0_9], %11 {strides = array<i32>} : memref<16x128xf32, #tpu.memory_space<vmem>>, vector<16x128xf32>,
    } else {
    }
    %c0 = arith.constant 0 : index
    %c0_1 = arith.constant 0 : index
    %3 = vector.load %arg1[%c0, %c0_1] : memref<16x128xf32, #tpu.memory_space<vmem>>, vector<16x128xf32>
    %4 = math.absf %3 : vector<16x128xf32>
    %c0_2 = arith.constant 0 : index
    %c0_3 = arith.constant 0 : index
    %5 = vector.load %arg3[%c0_2, %c0_3] : memref<16x128xf32, #tpu.memory_space<vmem>>, vector<16x128xf32>
    %6 = arith.maximumf %5, %4 : vector<16x128xf32>
    %c0_4 = arith.constant 0 : index
    %c0_5 = arith.constant 0 : index
    %7 = vector.load %arg3[%c0_4, %c0_5] : memref<16x128xf32, #tpu.memory_space<vmem>>, vector<16x128xf32>
    tpu.vector_store %arg3[%c0_4, %c0_5], %6 {strides = array<i32>} : memref<16x128xf32, #tpu.memory_space<vmem>>, vector<16x128xf32>,
    %c0_i32_6 = arith.constant 0 : i32
    %8 = arith.cmpi eq, %arg0, %c0_i32_6 : i32
    %9 = arith.extui %8 : i1 to i32
    %c0_i32_7 = arith.constant 0 : i32
    %10 = arith.cmpi ne, %9, %c0_i32_7 : i32
    scf.if %10 {
      %c0_8 = arith.constant 0 : index
      %c0_9 = arith.constant 0 : index
      %11 = vector.load %arg3[%c0_8, %c0_9] : memref<16x128xf32, #tpu.memory_space<vmem>>, vector<16x128xf32>
      %12 = vector.shape_cast %11 : vector<16x128xf32> to vector<1x16x128xf32>
      %cst = arith.constant dense<0xFF800000> : vector<1xf32>
      %13 = vector.multi_reduction <maximumf>, %12, %cst [1, 2] : vector<1x16x128xf32> to vector<1xf32>
      %14 = vector.shape_cast %13 : vector<1xf32> to vector<1x1x1xf32>
      %15 = vector.extract %14[0, 0, 0] : f32 from vector<1x1x1xf32>
      %c0_10 = arith.constant 0 : index
      %c0_11 = arith.constant 0 : index
      %16 = memref.load %arg2[%c0_10, %c0_11] : memref<1x1xf32, #tpu.memory_space<smem>>
      memref.store %15, %arg2[%c0_10, %c0_11] : memref<1x1xf32, #tpu.memory_space<smem>>
    } else {
    }
    return
  }
  func.func @transform_0(%arg0: i32) -> (i32, i32) {
    %c0_i32 = arith.constant 0 : i32
    %c0_i32_0 = arith.constant 0 : i32
    return %arg0, %c0_i32 : i32, i32
  }
  func.func @transform_1(%arg0: i32) -> (i32, i32) {
    %c0_i32 = arith.constant 0 : i32
    %c0_i32_0 = arith.constant 0 : i32
    %c0_i32_1 = arith.constant 0 : i32
    return %c0_i32, %c0_i32_0 : i32, i32
  }
}

</mosaic_0001>

<bundles_post_ra>
// kernel: tpu_custom_call.1
= control target key start
LH: loop header
LB: loop body
LE: loop exit
PB: predicated region body
PF: predicated region fallthrough
CT: control target
= control target key end

     0   :  { %6 = vsyncpa [#allocation4], 0  ;;  %s128_s0 = inlined_call_operand.hbm [shape: f32[16,128], index: 0, kind: input, shape index: {}]   ;;  %s129_s1 = inlined_call_operand.hbm [shape: f32[1,1], index: 1, kind: output, shape index: {}]  }
   0x1   :  { %7 = vsyncpa [#allocation5], 0  ;;  %s108_s6 = smov [#allocation3]  }
   0x2   :  { %s13_s7 = sshll.u32 %s108_s6, 4  ;;  %s14_s7 = int_to_ptr.vmem [resolvable:$true] %s13_s7 }
   0x3   :  { %s84_s8 = scalar_lea.vmem %s14_s7, 256  ;;  %p89_p1 = scmp.lt.s32.totalorder %s14_s7, %s14_s7 }
   0x4   :  { %p85_p0 = scmp.ne.s32.totalorder %s14_s7, %s84_s8  ;;  %p90_p2 = scmp.lt.s32.totalorder %s84_s8, %s84_s8 }
   0x6   :  { %p91_p3 = por %p90_p2, %p89_p1 }
   0x8   :  { %p92_p4 = pnand %p91_p3, %p85_p0 }
   0xa   :  { %95 = shalt.err (!%p92_p4)
}
   0xb   :  { %s109_s9 = smov 128   ;;  %s110_s10 = smov 8  }
   0xc   :  { %19 = dma.hbm_to_vmem [thread:$0]  %s128_s0, 256, %s14_s7, [#allocation4], %s109_s9, %s109_s9, %s110_s10  }
   0xd   :  { %104 = dma.done.wait [#allocation4], 256  }
   0xe   :  { %105 = vsyncadd [#allocation4], 4294967040  ;;  %v29_v0 = vld [vmem:[#allocation3] sm:$0xff]  ;;  %v30_v1 = vld [vmem:[#allocation3 + $0x8] sm:$0xff]  ;;  %s111_s0 = smov [#allocation6]  }
   0xf   :  { %v31_v2 = vand.u32 2147483647, %v29_v0  ;;  %v32_v3 = vand.u32 2147483647, %v30_v1 }
  0x11   :  { %v35_v4 = vmax.f32 %v31_v2, 0.0  ;;  %v36_v5 = vmax.f32 %v32_v3, 0.0 }
  0x13   :  { %v44_v6 = vmax.f32 %v35_v4, %v36_v5 }
  0x15   :  { %45 = vmax.xlane.f32.xlu0 %v44_v6 }
  0x9e   :  { %v46_v7 = vpop.xlane.xlu0 %45 }
  0x9f   :  { %v47_v8 = vrot.slane %v46_v7, 4 }
  0xa1   :  { %v48_v9 = vmax.f32 %v46_v7, %v47_v8 }
  0xa3   :  { %v49_v10 = vrot.slane %v48_v9, 2 }
  0xa5   :  { %v50_v11 = vmax.f32 %v48_v9, %v49_v10 }
  0xa7   :  { %v51_v12 = vrot.slane %v50_v11, 1 }
  0xa9   :  { %v52_v13 = vmax.f32 %v50_v11, %v51_v12 }
  0xab   :  { %70 = vpush %v52_v13 }
  0xdc   :  { %s71_s13 = spop %70 }
  0xdd   :  { %55 = sst [smem:[#allocation6]] %s71_s13 }
  0xde   :  { %63 = dma.smem_to_hbm %s111_s0, 16, %s129_s1, [#allocation5]  }
  0xdf   :  { %106 = dma.done.wait [#allocation5], 16  }
  0xe0   :  { %107 = vsyncadd [#allocation5], 4294967280 }
  0xe1   :  { %67 = sfence }
  0xe2   :  { %68 = vsyncpa [#allocation4], 1 }
  0xe3   :  { %69 = vsyncpa [#allocation5], 1 }

</bundles_post_ra>
